<compile_context>
chip_gen: v6e
topology: v6e:2x2x1
jax: 0.10.0
libtpu: 0.0.40
codegen_flags: <defaults>
</compile_context>

<pallas_src>
import jax
import jax.numpy as jnp
from jax.experimental import pallas as pl
from jax.experimental.pallas import tpu as pltpu


def _round_up(x, m):
    return ((x + m - 1) // m) * m


def _graph_embedding_kernel(x_ref, w_ref, b_ref, o_ref):
    # Fused sigmoid -> linear -> sigmoid on one batch tile, all in VMEM.
    x = x_ref[...].astype(jnp.float32)
    # sigmoid(x) = 0.5 * (tanh(x/2) + 1): a single EUP transcendental.
    s = 0.5 * (jnp.tanh(0.5 * x) + 1.0)                     # nn.Sigmoid()
    # (TB, d_in) @ (d_in, d_out_p) on the MXU; weight is pre-transposed f32.
    y = jnp.dot(s, w_ref[...], preferred_element_type=jnp.float32)
    y = y + b_ref[...]                                      # bias (f32, resident)
    o_ref[...] = (0.5 * (jnp.tanh(0.5 * y) + 1.0)).astype(o_ref.dtype)  # nn.Sigmoid()


def graph_embedding(x, weight, bias, *, block_b=4096, out_dtype=None):
    """x: (B, output_size); weight: (embedding_size, output_size) [PyTorch layout];
    bias: (embedding_size,).  Returns (B, embedding_size) in `out_dtype`
    (defaults to x.dtype)."""
    B, d_in = x.shape
    d_out, d_in_w = weight.shape
    assert d_in_w == d_in, "weight shape must be (embedding_size, output_size)"
    out_dtype = x.dtype if out_dtype is None else out_dtype

    # ---- One-time wrapper-side prep (weight is tiny: <= a few tens of KB) ----
    # f32 cast + transpose to (d_in, d_out) so the kernel does a plain K x N
    # contraction with no per-grid-step cast/relayout of the resident weight.
    d_out_p = _round_up(d_out, 128)                 # lane-dense output stores
    w = jnp.transpose(weight).astype(jnp.float32)   # (d_in, d_out)
    b = bias.astype(jnp.float32).reshape(1, d_out)  # 2-D for sublane broadcast
    if d_out_p != d_out:
        w = jnp.pad(w, ((0, 0), (0, d_out_p - d_out)))
        b = jnp.pad(b, ((0, 0), (0, d_out_p - d_out)))

    # ---- Batch tile selection: guarantee >= 2 grid steps for B > 256 so the
    # pipeline double-buffers and v7x's second TensorCore gets work. ----
    if B <= 256:
        tb = B
    else:
        n_steps = max(2, pl.cdiv(B, block_b))
        tb = min(block_b, _round_up(pl.cdiv(B, n_steps), 8))
        tb = min(tb, _round_up(B, 8))
    grid = (pl.cdiv(B, tb),)

    out = pl.pallas_call(
        _graph_embedding_kernel,
        out_shape=jax.ShapeDtypeStruct((B, d_out_p), out_dtype),
        grid=grid,
        in_specs=[
            pl.BlockSpec((tb, d_in), lambda i: (i, 0)),        # batch-tiled x
            pl.BlockSpec((d_in, d_out_p), lambda i: (0, 0)),   # weight: resident
            pl.BlockSpec((1, d_out_p), lambda i: (0, 0)),      # bias: resident
        ],
        out_specs=pl.BlockSpec((tb, d_out_p), lambda i: (i, 0)),
        compiler_params=pltpu.CompilerParams(
            dimension_semantics=("parallel",)),                # megacore on v7x
    )(x, w, b)

    if d_out_p != d_out:
        out = out[:, :d_out]
    return out


def _reference(x, weight, bias):
    s = jax.nn.sigmoid(x.astype(jnp.float32))
    y = s @ weight.T.astype(jnp.float32) + bias.astype(jnp.float32)
    return jax.nn.sigmoid(y)


if __name__ == "__main__":
    # Small shapes consistent with the module: Linear(output_size -> embedding_size).
    batch = 512
    output_size = 32      # input feature dim of the Linear
    embedding_size = 128  # output feature dim of the Linear (lane-dense)

    key = jax.random.PRNGKey(0)
    kx, kw, kb = jax.random.split(key, 3)

    x_f32 = jax.random.normal(kx, (batch, output_size), dtype=jnp.float32)

    # Deterministic init mimicking nn.Linear: U(-1/sqrt(fan_in), 1/sqrt(fan_in)).
    bound = 1.0 / (output_size ** 0.5)
    weight = jax.random.uniform(kw, (embedding_size, output_size),
                                minval=-bound, maxval=bound, dtype=jnp.float32)
    bias = jax.random.uniform(kb, (embedding_size,),
                              minval=-bound, maxval=bound, dtype=jnp.float32)

    ref = _reference(x_f32, weight, bias)

    # f32 I/O path (tight tolerance).  B=512 > 256 -> grid has >= 2 steps.
    out_f32 = jax.block_until_ready(graph_embedding(x_f32, weight, bias))
    assert out_f32.shape == (batch, embedding_size)
    assert jnp.allclose(out_f32, ref, atol=1e-5, rtol=1e-5), "f32 mismatch vs reference"

    # bf16 I/O path (halves HBM traffic; compute stays f32 in-kernel).
    x_bf16 = x_f32.astype(jnp.bfloat16)
    out_bf16 = jax.block_until_ready(
        graph_embedding(x_bf16, weight, bias, out_dtype=jnp.bfloat16))
    assert out_bf16.dtype == jnp.bfloat16
    assert jnp.allclose(out_bf16.astype(jnp.float32), ref, atol=2e-2, rtol=2e-2), \
        "bf16 mismatch vs reference"

    print("KERNEL_OK")
</pallas_src>

<mosaic_0001>
module attributes {stable_mosaic.version = 11 : i64} {
  func.func @_graph_embedding_kernel(%arg0: i32, %arg1: memref<256x32xf32, #tpu.memory_space<vmem>>, %arg2: memref<32x128xf32, #tpu.memory_space<vmem>>, %arg3: memref<1x128xf32, #tpu.memory_space<vmem>>, %arg4: memref<256x128xf32, #tpu.memory_space<vmem>>) attributes {dimension_semantics = [#tpu.dimension_semantics<parallel>], iteration_bounds = array<i64: 2>, scalar_prefetch = 0 : i64, scratch_operands = 0 : i64, tpu.core_type = #tpu.core_type<tc>, window_params = [{transform_indices = @transform_0, window_bounds = array<i64: 256, 32>}, {pipeline_mode = #tpu.pipeline_mode<synchronous>, transform_indices = @transform_1, window_bounds = array<i64: 32, 128>}, {pipeline_mode = #tpu.pipeline_mode<synchronous>, transform_indices = @transform_2, window_bounds = array<i64: 1, 128>}, {transform_indices = @transform_3, window_bounds = array<i64: 256, 128>}]} {
    %c0 = arith.constant 0 : index
    %c0_0 = arith.constant 0 : index
    %0 = vector.load %arg1[%c0, %c0_0] : memref<256x32xf32, #tpu.memory_space<vmem>>, vector<256x32xf32>
    %cst = arith.constant 5.000000e-01 : f32
    %1 = vector.broadcast %cst : f32 to vector<256x32xf32>
    %2 = arith.mulf %1, %0 : vector<256x32xf32>
    %3 = math.tanh %2 : vector<256x32xf32>
    %cst_1 = arith.constant 1.000000e+00 : f32
    %4 = vector.broadcast %cst_1 : f32 to vector<256x32xf32>
    %5 = arith.addf %3, %4 : vector<256x32xf32>
    %cst_2 = arith.constant 5.000000e-01 : f32
    %6 = vector.broadcast %cst_2 : f32 to vector<256x32xf32>
    %7 = arith.mulf %6, %5 : vector<256x32xf32>
    %c0_3 = arith.constant 0 : index
    %c0_4 = arith.constant 0 : index
    %8 = vector.load %arg2[%c0_3, %c0_4] : memref<32x128xf32, #tpu.memory_space<vmem>>, vector<32x128xf32>
    %cst_5 = arith.constant dense<0.000000e+00> : vector<256x128xf32>
    %9 = tpu.matmul %7, %8, %cst_5 {dimension_numbers = #tpu.dot_dimension_numbers<[1], [0], [0], [1], [0, 0, 1, 1], [], []>} : vector<256x32xf32>, vector<32x128xf32>, vector<256x128xf32> -> vector<256x128xf32>
    %c0_6 = arith.constant 0 : index
    %c0_7 = arith.constant 0 : index
    %10 = vector.load %arg3[%c0_6, %c0_7] : memref<1x128xf32, #tpu.memory_space<vmem>>, vector<1x128xf32>
    %11 = vector.broadcast %10 : vector<1x128xf32> to vector<256x128xf32>
    %12 = arith.addf %9, %11 : vector<256x128xf32>
    %cst_8 = arith.constant 5.000000e-01 : f32
    %13 = vector.broadcast %cst_8 : f32 to vector<256x128xf32>
    %14 = arith.mulf %13, %12 : vector<256x128xf32>
    %15 = math.tanh %14 : vector<256x128xf32>
    %cst_9 = arith.constant 1.000000e+00 : f32
    %16 = vector.broadcast %cst_9 : f32 to vector<256x128xf32>
    %17 = arith.addf %15, %16 : vector<256x128xf32>
    %cst_10 = arith.constant 5.000000e-01 : f32
    %18 = vector.broadcast %cst_10 : f32 to vector<256x128xf32>
    %19 = arith.mulf %18, %17 : vector<256x128xf32>
    %c0_11 = arith.constant 0 : index
    %c0_12 = arith.constant 0 : index
    %20 = vector.load %arg4[%c0_11, %c0_12] : memref<256x128xf32, #tpu.memory_space<vmem>>, vector<256x128xf32>
    tpu.vector_store %arg4[%c0_11, %c0_12], %19 {strides = array<i32>} : memref<256x128xf32, #tpu.memory_space<vmem>>, vector<256x128xf32>,
    return
  }
  func.func @transform_0(%arg0: i32) -> (i32, i32) {
    %c0_i32 = arith.constant 0 : i32
    %c0_i32_0 = arith.constant 0 : i32
    return %arg0, %c0_i32 : i32, i32
  }
  func.func @transform_1(%arg0: i32) -> (i32, i32) {
    %c0_i32 = arith.constant 0 : i32
    %c0_i32_0 = arith.constant 0 : i32
    %c0_i32_1 = arith.constant 0 : i32
    return %c0_i32, %c0_i32_0 : i32, i32
  }
  func.func @transform_2(%arg0: i32) -> (i32, i32) {
    %c0_i32 = arith.constant 0 : i32
    %c0_i32_0 = arith.constant 0 : i32
    %c0_i32_1 = arith.constant 0 : i32
    return %c0_i32, %c0_i32_0 : i32, i32
  }
  func.func @transform_3(%arg0: i32) -> (i32, i32) {
    %c0_i32 = arith.constant 0 : i32
    %c0_i32_0 = arith.constant 0 : i32
    return %arg0, %c0_i32 : i32, i32
  }
}

</mosaic_0001>

<bundles_post_ra>
// kernel: tpu_custom_call.1
= control target key start
LH: loop header
LB: loop body
LE: loop exit
PB: predicated region body
PF: predicated region fallthrough
CT: control target
= control target key end

     0   :  { %8 = vsyncpa [#allocation3], 0  ;;  %s1559_s0 = inlined_call_operand.vmem [shape: f32[512,32], index: 0, kind: input, shape index: {}]   ;;  %s1560_s1 = inlined_call_operand.vmem [shape: f32[32,128], index: 1, kind: input, shape index: {}]   ;;  %s1561_s2 = inlined_call_operand.vmem [shape: f32[1,128], index: 2, kind: input, shape index: {}]   ;;  %s1562_s3 = inlined_call_operand.hbm [shape: f32[512,128], index: 3, kind: output, shape index: {}]  }
   0x1   :  { %10 = vsyncpa [#allocation3 + $0x1], 0  ;;  %s1301_s12 = smov 0   ;;  %s1303_s13 = smov 0  }
   0x2   :  { %s1305_s14 = smov 0   ;;  %s1307_s15 = smov 0  }
   0x3 LB: > { %s1322_s16 = sadd.s32 4294967295, %s1276_s15   ;;  %s901_s17 = sadd.s32 4294967294, %s1276_s15   ;;  %s1276_s15 = sphi %s1307_s15, %s1568_s15   ;;  %s1272_s14 = sphi %s1305_s14, %s1567_s14   ;;  %s1268_s13 = sphi %s1303_s13, %s1566_s13   ;;  %s1264_s12 = sphi %s1301_s12, %s1565_s12  }
   0x4   : > { %s1326_s18 = sadd.s32 1, %s1276_s15   ;;  %s91_s19 = sadd.s32 1, %s1272_s14 }
   0x5   : > { %s88_s20 = ssub.s32 %s1276_s15, %s1326_s18  ;;  %p101_p0 = scmp.ne.s32.totalorder %s1272_s14, %s1268_s13 }
   0x6   : > { %p89_p1 = scmp.eq.s32.totalorder %s88_s20, 0  ;;  %p102_p2 = scmp.eq.s32.totalorder %s1322_s16, 1 }
   0x7   : > { %p107_p3 = scmp.ne.s32.totalorder %s1268_s13, %s1264_s12  ;;  %p108_p4 = scmp.eq.s32.totalorder %s901_s17, 1 }
   0x8   : > { %s1337_s21 = scalar_select %p89_p1, %s1272_s14, %s91_s19  }
   0x9   : > { %p1339_p5 = por %p102_p2, %p101_p0  ;;  %p1343_p6 = por %p108_p4, %p107_p3 }
   0xa   : > { %p904_p7 = scmp.ge.s32.totalorder %s1276_s15, 1  ;;  %p141_p8 = scmp.lt.s32.totalorder %s1276_s15, 3 }
   0xc   : > { %p142_p9 = pnand %p904_p7, %p141_p8 }
   0xd   : > { %s906_s28 = sshll.u32 (!%p142_p9), %s1322_s16, 5  ;;  %s162_s17 = sand.u32 (!%p142_p9), 1, %s1268_s13  }
   0xe   : > { %145 = sbr.rel (%p142_p9) target bundleno = 311 (0x137), region = 32  ;;  %p166_p10 = scmp.lt.s32.totalorder (!%p142_p9), %s906_s28, 63 }
   0xf   : > { %s1455_s19 = sshll.u32 (!%p142_p9), %s162_s17, 8  ;;  %s946_s24 = sshll.u32 (!%p142_p9), %s1322_s16, 12 }
  0x10   : > { %s1462_s20 = scalar_lea.vmem (!%p142_p9), [#allocation2], %s1455_s19  ;;  %s1519_s16 = scalar_lea.sflag (!%p142_p9), [#allocation3], %s162_s17 }
  0x11   : > { %s839_s25 = sshll.u32 (!%p142_p9), %s1462_s20, 4  ;;  %s1278_s30 = smov (!%p142_p9), [#allocation2]   ;;  %s1512_s25 = int_to_ptr.vmem [resolvable:$true] %s839_s25 }
  0x12   : > { %s1216_s29 = scalar_lea.vmem (!%p142_p9), %s1512_s25, 4096  ;;  %s1220_s4 = sshll.u32 (!%p142_p9), %s1278_s30, 4  ;;  %s1221_s4 = int_to_ptr.vmem [resolvable:$false] %s1220_s4 }
  0x13   : > { %v335_v0 = vld [vmem:[%s1560_s1 + $0x18] sm:$0xff]  ;;  %v334_v1 = vld [vmem:[%s1560_s1 + $0x10] sm:$0xff]  ;;  %v333_v2 = vld [vmem:[%s1560_s1 + $0x8] sm:$0xff]  ;;  %s1570_s28 = smov (!%p166_p10, %s906_s28), 63  ;;  %vm343_vm0 = vcmask 261120   ;;  %p1217_p11 = scmp.ne.s32.totalorder %s1512_s25, %s1216_s29 }
  0x14   : > { %983 = vmatprep.subr.mxu0 %v335_v0  ;;  %1039 = vmatprep.subr.mxu1 %v335_v0  ;;  %v332_v3 = vld [vmem:[%s1560_s1] sm:$0xff]  ;;  %s907_s6 = sshll.u32 %s1570_s28, 3  ;;  %s1510_s28 = scalar_lea.hbm %s1562_s3, %s946_s24 }
  0x15   : > { %984 = vmatpush3.msra.mxu0 %v335_v0  ;;  %1043 = vmatpush3.msra.mxu1 %v335_v0  ;;  %s1365_s9 = scalar_lea.vmem %s1559_s0, %s907_s6  ;;  %p1218_p12 = pnand %p1217_p11, %p1339_p5 }
  0x16   : > { %985 = vmatprep.subr.mxu0 %v334_v1  ;;  %1040 = vmatprep.subr.mxu1 %v334_v1  ;;  %v172_v4 = vld [vmem:[%s1365_s9] sm:$0xff]  ;;  %v173_v6 = vld [vmem:[%s1365_s9 + $0x8] sm:$0xff]  ;;  %v174_v11 = vld [vmem:[%s1365_s9 + $0x10] sm:$0xff]  ;;  %s1222_s5 = scalar_lea.vmem %s1221_s4, 8192  ;;  %p1223_p0 = scmp.lt.s32.totalorder %s1512_s25, %s1221_s4 }
  0x17   : > { %986 = vmatpush3.msra.mxu0 %v334_v1  ;;  %1044 = vmatpush3.msra.mxu1 %v334_v1  ;;  %v188_v5 = vld [vmem:[%s1365_s9 + $0x80] sm:$0xff]  ;;  %v204_v7 = vmul.f32 0.5, %v172_v4  ;;  %v205_v9 = vmul.f32 0.5, %v173_v6  ;;  %v189_v10 = vld [vmem:[%s1365_s9 + $0x88] sm:$0xff]  ;;  %v190_v12 = vld [vmem:[%s1365_s9 + $0x90] sm:$0xff]  ;;  %v206_v15 = vmul.f32 0.5, %v174_v11  ;;  %p1219_p13 = pneg %p1218_p12  ;;  %p1224_p1 = scmp.lt.s32.totalorder %s1222_s5, %s1216_s29 }
  0x18   : > { %987 = vmatprep.subr.mxu0 %v333_v2  ;;  %1041 = vmatprep.subr.mxu1 %v333_v2  ;;  %v220_v8 = vmul.f32 0.5, %v188_v5  ;;  %v221_v13 = vmul.f32 0.5, %v189_v10  ;;  %v175_v14 = vld [vmem:[%s1365_s9 + $0x18] sm:$0xff]  ;;  %v222_v17 = vmul.f32 0.5, %v190_v12  ;;  %v176_v18 = vld [vmem:[%s1365_s9 + $0x20] sm:$0xff]  ;;  %v177_v22 = vld [vmem:[%s1365_s9 + $0x28] sm:$0xff] }
  0x19   : > { %988 = vmatpush3.msra.mxu0 %v333_v2  ;;  %1045 = vmatpush3.msra.mxu1 %v333_v2  ;;  %1088 = vtanh.f32 %v204_v7  ;;  %v191_v16 = vld [vmem:[%s1365_s9 + $0x98] sm:$0xff]  ;;  %v207_v19 = vmul.f32 0.5, %v175_v14  ;;  %v192_v20 = vld [vmem:[%s1365_s9 + $0xa0] sm:$0xff]  ;;  %v208_v23 = vmul.f32 0.5, %v176_v18  ;;  %v193_v24 = vld [vmem:[%s1365_s9 + $0xa8] sm:$0xff]  ;;  %v209_v27 = vmul.f32 0.5, %v177_v22  ;;  %p1225_p2 = por %p1224_p1, %p1223_p0 }
  0x1a   : > { %989 = vmatprep.subr.mxu0 %v332_v3  ;;  %1042 = vmatprep.subr.mxu1 %v332_v3  ;;  %1090 = vtanh.f32 %v220_v8  ;;  %v223_v21 = vmul.f32 0.5, %v191_v16  ;;  %v224_v25 = vmul.f32 0.5, %v192_v20  ;;  %v178_v26 = vld [vmem:[%s1365_s9 + $0x30] sm:$0xff]  ;;  %v225_v29 = vmul.f32 0.5, %v193_v24  ;;  %v179_v30 = vld [vmem:[%s1365_s9 + $0x38] sm:$0xff]  ;;  %v180_v34 = vld [vmem:[%s1365_s9 + $0x40] sm:$0xff] }
  0x1b   : > { %990 = vmatpush3.msra.mxu0 %v332_v3  ;;  %1046 = vmatpush3.msra.mxu1 %v332_v3  ;;  %1092 = vtanh.f32 %v205_v9  ;;  %v194_v28 = vld [vmem:[%s1365_s9 + $0xb0] sm:$0xff]  ;;  %v210_v31 = vmul.f32 0.5, %v178_v26  ;;  %v195_v32 = vld [vmem:[%s1365_s9 + $0xb8] sm:$0xff]  ;;  %v211_v35 = vmul.f32 0.5, %v179_v30  ;;  %v196_v36 = vld [vmem:[%s1365_s9 + $0xc0] sm:$0xff]  ;;  %v212_v39 = vmul.f32 0.5, %v180_v34  ;;  %p1226_p3 = pnand %p1225_p2, %p1219_p13 }
  0x1c   : > { %1094 = vtanh.f32 %v221_v13  ;;  %v226_v33 = vmul.f32 0.5, %v194_v28  ;;  %v227_v37 = vmul.f32 0.5, %v195_v32  ;;  %v181_v38 = vld [vmem:[%s1365_s9 + $0x48] sm:$0xff]  ;;  %v228_v42 = vmul.f32 0.5, %v196_v36  ;;  %v182_v43 = vld [vmem:[%s1365_s9 + $0x50] sm:$0xff]  ;;  %v183_v51 = vld [vmem:[%s1365_s9 + $0x58] sm:$0xff] }
  0x1d   : > { %1096 = vtanh.f32 %v206_v15  ;;  %v197_v40 = vld [vmem:[%s1365_s9 + $0xc8] sm:$0xff]  ;;  %v213_v46 = vmul.f32 0.5, %v181_v38  ;;  %v198_v47 = vld [vmem:[%s1365_s9 + $0xd0] sm:$0xff]  ;;  %v214_v55 = vmul.f32 0.5, %v182_v43  ;;  %v199_v56 = vld [vmem:[%s1365_s9 + $0xd8] sm:$0xff]  ;;  %v215_v1 = vmul.f32 0.5, %v183_v51 }
  0x1e   : > { %1098 = vtanh.f32 %v222_v17  ;;  %v229_v50 = vmul.f32 0.5, %v197_v40  ;;  %v230_v60 = vmul.f32 0.5, %v198_v47  ;;  %v184_v61 = vld [vmem:[%s1365_s9 + $0x60] sm:$0xff]  ;;  %v231_v6 = vmul.f32 0.5, %v199_v56  ;;  %v185_v7 = vld [vmem:[%s1365_s9 + $0x68] sm:$0xff]  ;;  %v186_v17 = vld [vmem:[%s1365_s9 + $0x70] sm:$0xff] }
  0x1f   : > { %1100 = vtanh.f32 %v207_v19  ;;  %v200_v2 = vld [vmem:[%s1365_s9 + $0xe0] sm:$0xff]  ;;  %v216_v11 = vmul.f32 0.5, %v184_v61  ;;  %v201_v12 = vld [vmem:[%s1365_s9 + $0xe8] sm:$0xff]  ;;  %v202_v22 = vld [vmem:[%s1365_s9 + $0xf0] sm:$0xff] }
  0x20   : > { %1102 = vtanh.f32 %v223_v21  ;;  %v232_v16 = vmul.f32 0.5, %v200_v2  ;;  %v217_v21 = vmul.f32 0.5, %v185_v7  ;;  %v233_v26 = vmul.f32 0.5, %v201_v12  ;;  %v203_v32 = vld [vmem:[%s1365_s9 + $0xf8] sm:$0xff] }
  0x21   : > { %1104 = vtanh.f32 %v208_v23  ;;  %v234_v36 = vmul.f32 0.5, %v202_v22 }
  0x22   : > { %1106 = vtanh.f32 %v224_v25 }
  0x23   : > { %1108 = vtanh.f32 %v209_v27  ;;  %v187_v27 = vld [vmem:[%s1365_s9 + $0x78] sm:$0xff] }
  0x24   : > { %1110 = vtanh.f32 %v225_v29  ;;  %v219_v40 = vmul.f32 0.5, %v187_v27 }
  0x25   : > { %1112 = vtanh.f32 %v210_v31  ;;  %v218_v31 = vmul.f32 0.5, %v186_v17 }
  0x26   : > { %v1089_v41 = vpop.eup %1088  ;;  %1114 = vtanh.f32 %v226_v33 }
  0x27   : > { %v1091_v44 = vpop.eup %1090  ;;  %v268_v45 = vadd.f32 1.0, %v1089_v41  ;;  %1116 = vtanh.f32 %v211_v35 }
  0x28   : > { %v1093_v48 = vpop.eup %1092  ;;  %v284_v49 = vadd.f32 1.0, %v1091_v44  ;;  %1118 = vtanh.f32 %v227_v37  ;;  %v235_v44 = vmul.f32 0.5, %v203_v32 }
  0x29   : > { %v1095_v52 = vpop.eup %1094  ;;  %v300_v53 = vmul.f32 0.5, %v268_v45  ;;  %v269_v54 = vadd.f32 1.0, %v1093_v48  ;;  %1120 = vtanh.f32 %v212_v39 }
  0x2a   : > { %v1097_v57 = vpop.eup %1096  ;;  %v316_v58 = vmul.f32 0.5, %v284_v49  ;;  %v285_v59 = vadd.f32 1.0, %v1095_v52  ;;  %1122 = vtanh.f32 %v228_v42 }
  0x2b   : > { %v1099_v62 = vpop.eup %1098  ;;  %991 = vmatprep.mubr.msk.f32.mxu0 %vm343_vm0, %v300_v53  ;;  %v301_v63 = vmul.f32 0.5, %v269_v54  ;;  %v270_v0 = vadd.f32 1.0, %v1097_v57  ;;  %1124 = vtanh.f32 %v213_v46 }
  0x2c   : > { %v1101_v3 = vpop.eup %1100  ;;  %1015 = vmatprep.mubr.msk.f32.mxu1 %vm343_vm0, %v316_v58  ;;  %v317_v4 = vmul.f32 0.5, %v285_v59  ;;  %v286_v5 = vadd.f32 1.0, %v1099_v62  ;;  %1126 = vtanh.f32 %v229_v50 }
  0x2d   : > { %v1103_v8 = vpop.eup %1102  ;;  %992 = vmatmul.mubr.msk.f32.vlgmr.msra.gmra.mxu0 %vm343_vm0, %v301_v63  ;;  %v302_v9 = vmul.f32 0.5, %v270_v0  ;;  %v271_v10 = vadd.f32 1.0, %v1101_v3  ;;  %1128 = vtanh.f32 %v214_v55 }
  0x2e   : > { %v1105_v13 = vpop.eup %1104  ;;  %1016 = vmatmul.mubr.msk.f32.vlgmr.msra.gmra.mxu1 %vm343_vm0, %v317_v4  ;;  %v318_v14 = vmul.f32 0.5, %v286_v5  ;;  %v287_v15 = vadd.f32 1.0, %v1103_v8  ;;  %1130 = vtanh.f32 %v230_v60 }
  0x2f   : > { %v1107_v18 = vpop.eup %1106  ;;  %994 = vmatprep.mubr.msk.f32.mxu0 %vm343_vm0, %v302_v9  ;;  %v303_v19 = vmul.f32 0.5, %v271_v10  ;;  %v272_v20 = vadd.f32 1.0, %v1105_v13  ;;  %1132 = vtanh.f32 %v215_v1 }
  0x30   : > { %v1109_v23 = vpop.eup %1108  ;;  %1018 = vmatprep.mubr.msk.f32.mxu1 %vm343_vm0, %v318_v14  ;;  %v319_v24 = vmul.f32 0.5, %v287_v15  ;;  %v288_v25 = vadd.f32 1.0, %v1107_v18  ;;  %1134 = vtanh.f32 %v231_v6 }
  0x31   : > { %v1111_v28 = vpop.eup %1110  ;;  %995 = vmatmul.mubr.msk.f32.gmra.mxu0 %vm343_vm0, %v303_v19  ;;  %v304_v29 = vmul.f32 0.5, %v272_v20  ;;  %v273_v30 = vadd.f32 1.0, %v1109_v23  ;;  %1136 = vtanh.f32 %v216_v11 }
  0x32   : > { %v1113_v33 = vpop.eup %1112  ;;  %1019 = vmatmul.mubr.msk.f32.gmra.mxu1 %vm343_vm0, %v319_v24  ;;  %v320_v34 = vmul.f32 0.5, %v288_v25  ;;  %v289_v35 = vadd.f32 1.0, %v1111_v28  ;;  %1138 = vtanh.f32 %v232_v16 }
  0x33   : > { %v1115_v37 = vpop.eup %1114  ;;  %997 = vmatprep.mubr.msk.f32.mxu0 %vm343_vm0, %v304_v29  ;;  %v305_v38 = vmul.f32 0.5, %v273_v30  ;;  %v274_v39 = vadd.f32 1.0, %v1113_v33  ;;  %1140 = vtanh.f32 %v217_v21 }
  0x34   : > { %v1117_v41 = vpop.eup %1116  ;;  %1021 = vmatprep.mubr.msk.f32.mxu1 %vm343_vm0, %v320_v34  ;;  %v321_v42 = vmul.f32 0.5, %v289_v35  ;;  %v290_v43 = vadd.f32 1.0, %v1115_v37  ;;  %1142 = vtanh.f32 %v233_v26 }
  0x35   : > { %v1119_v45 = vpop.eup %1118  ;;  %998 = vmatmul.mubr.msk.f32.gmra.mxu0 %vm343_vm0, %v305_v38  ;;  %v306_v46 = vmul.f32 0.5, %v274_v39  ;;  %v275_v47 = vadd.f32 1.0, %v1117_v41  ;;  %1144 = vtanh.f32 %v218_v31 }
  0x36   : > { %v1121_v48 = vpop.eup %1120  ;;  %1022 = vmatmul.mubr.msk.f32.gmra.mxu1 %vm343_vm0, %v321_v42  ;;  %v322_v49 = vmul.f32 0.5, %v290_v43  ;;  %v291_v50 = vadd.f32 1.0, %v1119_v45  ;;  %1146 = vtanh.f32 %v234_v36  ;;  %v1434_v36 = vld [vmem:[%s1561_s2] ss:$0 sm:$0xff] }
  0x37   : > { %v1123_v51 = vpop.eup %1122  ;;  %1000 = vmatprep.mubr.msk.f32.mxu0 %vm343_vm0, %v306_v46  ;;  %v307_v52 = vmul.f32 0.5, %v275_v47  ;;  %v276_v53 = vadd.f32 1.0, %v1121_v48  ;;  %1148 = vtanh.f32 %v219_v40 }
  0x38   : > { %v1125_v54 = vpop.eup %1124  ;;  %1024 = vmatprep.mubr.msk.f32.mxu1 %vm343_vm0, %v322_v49  ;;  %v323_v55 = vmul.f32 0.5, %v291_v50  ;;  %v292_v56 = vadd.f32 1.0, %v1123_v51  ;;  %1150 = vtanh.f32 %v235_v44 }
  0x39   : > { %v1127_v57 = vpop.eup %1126  ;;  %1001 = vmatmul.mubr.msk.f32.gmra.mxu0 %vm343_vm0, %v307_v52  ;;  %v308_v58 = vmul.f32 0.5, %v276_v53  ;;  %v277_v59 = vadd.f32 1.0, %v1125_v54 }
  0x3a   : > { %v1129_v60 = vpop.eup %1128  ;;  %1025 = vmatmul.mubr.msk.f32.gmra.mxu1 %vm343_vm0, %v323_v55  ;;  %v324_v61 = vmul.f32 0.5, %v292_v56  ;;  %v293_v62 = vadd.f32 1.0, %v1127_v57 }
  0x3b   : > { %v1131_v63 = vpop.eup %1130  ;;  %1003 = vmatprep.mubr.msk.f32.mxu0 %vm343_vm0, %v308_v58  ;;  %v309_v0 = vmul.f32 0.5, %v277_v59  ;;  %v278_v1 = vadd.f32 1.0, %v1129_v60 }
  0x3c   : > { %v1133_v2 = vpop.eup %1132  ;;  %1027 = vmatprep.mubr.msk.f32.mxu1 %vm343_vm0, %v324_v61  ;;  %v325_v3 = vmul.f32 0.5, %v293_v62  ;;  %v294_v4 = vadd.f32 1.0, %v1131_v63 }
  0x3d   : > { %v1135_v5 = vpop.eup %1134  ;;  %1004 = vmatmul.mubr.msk.f32.gmra.mxu0 %vm343_vm0, %v309_v0  ;;  %v310_v6 = vmul.f32 0.5, %v278_v1  ;;  %v279_v7 = vadd.f32 1.0, %v1133_v2 }
  0x3e   : > { %v1137_v8 = vpop.eup %1136  ;;  %1028 = vmatmul.mubr.msk.f32.gmra.mxu1 %vm343_vm0, %v325_v3  ;;  %v326_v9 = vmul.f32 0.5, %v294_v4  ;;  %v295_v10 = vadd.f32 1.0, %v1135_v5 }
  0x3f   : > { %v1139_v11 = vpop.eup %1138  ;;  %1006 = vmatprep.mubr.msk.f32.mxu0 %vm343_vm0, %v310_v6  ;;  %v311_v12 = vmul.f32 0.5, %v279_v7  ;;  %v280_v13 = vadd.f32 1.0, %v1137_v8 }
  0x40   : > { %v1141_v14 = vpop.eup %1140  ;;  %1030 = vmatprep.mubr.msk.f32.mxu1 %vm343_vm0, %v326_v9  ;;  %v327_v15 = vmul.f32 0.5, %v295_v10  ;;  %v296_v16 = vadd.f32 1.0, %v1139_v11 }
  0x41   : > { %v1143_v17 = vpop.eup %1142  ;;  %1007 = vmatmul.mubr.msk.f32.gmra.mxu0 %vm343_vm0, %v311_v12  ;;  %v312_v18 = vmul.f32 0.5, %v280_v13  ;;  %v281_v19 = vadd.f32 1.0, %v1141_v14 }
  0x42   : > { %v1145_v20 = vpop.eup %1144  ;;  %1031 = vmatmul.mubr.msk.f32.gmra.mxu1 %vm343_vm0, %v327_v15  ;;  %v328_v21 = vmul.f32 0.5, %v296_v16  ;;  %v297_v22 = vadd.f32 1.0, %v1143_v17 }
  0x43   : > { %v1147_v23 = vpop.eup %1146  ;;  %1009 = vmatprep.mubr.msk.f32.mxu0 %vm343_vm0, %v312_v18  ;;  %v313_v24 = vmul.f32 0.5, %v281_v19  ;;  %v282_v25 = vadd.f32 1.0, %v1145_v20 }
  0x44   : > { %v1149_v26 = vpop.eup %1148  ;;  %1033 = vmatprep.mubr.msk.f32.mxu1 %vm343_vm0, %v328_v21  ;;  %v329_v27 = vmul.f32 0.5, %v297_v22  ;;  %v298_v28 = vadd.f32 1.0, %v1147_v23 }
  0x45   : > { %v1151_v29 = vpop.eup %1150  ;;  %1010 = vmatmul.mubr.msk.f32.gmra.mxu0 %vm343_vm0, %v313_v24  ;;  %v314_v30 = vmul.f32 0.5, %v282_v25  ;;  %v283_v31 = vadd.f32 1.0, %v1149_v26 }
  0x46   : > { %1034 = vmatmul.mubr.msk.f32.gmra.mxu1 %vm343_vm0, %v329_v27  ;;  %v330_v32 = vmul.f32 0.5, %v298_v28  ;;  %v299_v33 = vadd.f32 1.0, %v1151_v29 }
  0x47   : > { %1012 = vmatprep.mubr.msk.f32.mxu0 %vm343_vm0, %v314_v30  ;;  %v315_v34 = vmul.f32 0.5, %v283_v31 }
  0x48   : > { %1036 = vmatprep.mubr.msk.f32.mxu1 %vm343_vm0, %v330_v32  ;;  %v331_v35 = vmul.f32 0.5, %v299_v33 }
  0x49   : > { %1013 = vmatmul.mubr.msk.f32.gmra.mxu0 %vm343_vm0, %v315_v34 }
  0x4a   : > { %1037 = vmatmul.mubr.msk.f32.gmra.mxu1 %vm343_vm0, %v331_v35 }
  0xed   : > { %v993_v37 = vpop.f32.mrf.mxu0 }
  0xee   : > { %v512_v38 = vadd.f32 %v993_v37, %v1434_v36  ;;  %v1017_v39 = vpop.f32.mrf.mxu1 }
  0xef   : > { %v592_v40 = vadd.f32 %v1017_v39, %v1434_v36  ;;  %v506_v41 = vpop.f32.mrf.mxu0 }
  0xf0   : > { %v666_v42 = vmul.f32 0.5, %v512_v38  ;;  %v507_v43 = vadd.f32 %v1434_v36, %v506_v41  ;;  %v586_v44 = vpop.f32.mrf.mxu1 }
  0xf1   : > { %v682_v45 = vmul.f32 0.5, %v592_v40  ;;  %v587_v46 = vadd.f32 %v1434_v36, %v586_v44  ;;  %v996_v47 = vpop.f32.mrf.mxu0 }
  0xf2   : > { %1152 = vtanh.f32 %v666_v42  ;;  %v665_v48 = vmul.f32 0.5, %v507_v43  ;;  %v522_v49 = vadd.f32 %v996_v47, %v1434_v36  ;;  %v1020_v50 = vpop.f32.mrf.mxu1 }
  0xf3   : > { %1154 = vtanh.f32 %v682_v45  ;;  %v681_v51 = vmul.f32 0.5, %v587_v46  ;;  %v602_v52 = vadd.f32 %v1020_v50, %v1434_v36  ;;  %v516_v53 = vpop.f32.mrf.mxu0 }
  0xf4   : > { %1156 = vtanh.f32 %v665_v48  ;;  %v668_v54 = vmul.f32 0.5, %v522_v49  ;;  %v517_v55 = vadd.f32 %v1434_v36, %v516_v53  ;;  %v596_v56 = vpop.f32.mrf.mxu1 }
  0xf5   : > { %1158 = vtanh.f32 %v681_v51  ;;  %v684_v57 = vmul.f32 0.5, %v602_v52  ;;  %v597_v58 = vadd.f32 %v1434_v36, %v596_v56  ;;  %v999_v59 = vpop.f32.mrf.mxu0 }
  0xf6   : > { %1160 = vtanh.f32 %v668_v54  ;;  %v667_v60 = vmul.f32 0.5, %v517_v55  ;;  %v532_v61 = vadd.f32 %v999_v59, %v1434_v36  ;;  %v1023_v62 = vpop.f32.mrf.mxu1 }
  0xf7   : > { %1162 = vtanh.f32 %v684_v57  ;;  %v683_v63 = vmul.f32 0.5, %v597_v58  ;;  %v612_v0 = vadd.f32 %v1023_v62, %v1434_v36  ;;  %v526_v1 = vpop.f32.mrf.mxu0 }
  0xf8   : > { %1164 = vtanh.f32 %v667_v60  ;;  %v670_v2 = vmul.f32 0.5, %v532_v61  ;;  %v527_v3 = vadd.f32 %v1434_v36, %v526_v1  ;;  %v606_v4 = vpop.f32.mrf.mxu1 }
  0xf9   : > { %1166 = vtanh.f32 %v683_v63  ;;  %v686_v5 = vmul.f32 0.5, %v612_v0  ;;  %v607_v6 = vadd.f32 %v1434_v36, %v606_v4  ;;  %v1002_v7 = vpop.f32.mrf.mxu0 }
  0xfa   : > { %1168 = vtanh.f32 %v670_v2  ;;  %v669_v8 = vmul.f32 0.5, %v527_v3  ;;  %v542_v9 = vadd.f32 %v1002_v7, %v1434_v36  ;;  %v1026_v10 = vpop.f32.mrf.mxu1 }
  0xfb   : > { %1170 = vtanh.f32 %v686_v5  ;;  %v685_v11 = vmul.f32 0.5, %v607_v6  ;;  %v622_v12 = vadd.f32 %v1026_v10, %v1434_v36  ;;  %v536_v13 = vpop.f32.mrf.mxu0 }
  0xfc   : > { %1172 = vtanh.f32 %v669_v8  ;;  %v672_v14 = vmul.f32 0.5, %v542_v9  ;;  %v537_v15 = vadd.f32 %v1434_v36, %v536_v13  ;;  %v616_v16 = vpop.f32.mrf.mxu1 }
  0xfd   : > { %1174 = vtanh.f32 %v685_v11  ;;  %v688_v17 = vmul.f32 0.5, %v622_v12  ;;  %v617_v18 = vadd.f32 %v1434_v36, %v616_v16  ;;  %v1005_v19 = vpop.f32.mrf.mxu0 }
  0xfe   : > { %1176 = vtanh.f32 %v672_v14  ;;  %v671_v20 = vmul.f32 0.5, %v537_v15  ;;  %v552_v21 = vadd.f32 %v1005_v19, %v1434_v36  ;;  %v1029_v22 = vpop.f32.mrf.mxu1 }
  0xff   : > { %v1153_v23 = vpop.eup %1152  ;;  %1178 = vtanh.f32 %v688_v17  ;;  %v687_v24 = vmul.f32 0.5, %v617_v18  ;;  %v632_v25 = vadd.f32 %v1029_v22, %v1434_v36  ;;  %v546_v26 = vpop.f32.mrf.mxu0 }
 0x100   : > { %v1155_v27 = vpop.eup %1154  ;;  %v730_v28 = vadd.f32 1.0, %v1153_v23  ;;  %1180 = vtanh.f32 %v671_v20  ;;  %v674_v29 = vmul.f32 0.5, %v552_v21  ;;  %v547_v30 = vadd.f32 %v1434_v36, %v546_v26  ;;  %v626_v31 = vpop.f32.mrf.mxu1 }
 0x101   : > { %v1157_v32 = vpop.eup %1156  ;;  %v746_v33 = vadd.f32 1.0, %v1155_v27  ;;  %1182 = vtanh.f32 %v687_v24  ;;  %v690_v34 = vmul.f32 0.5, %v632_v25  ;;  %v627_v35 = vadd.f32 %v1434_v36, %v626_v31  ;;  %v1008_v37 = vpop.f32.mrf.mxu0 }
 0x102   : > { %v1159_v38 = vpop.eup %1158  ;;  %v762_v39 = vmul.f32 0.5, %v730_v28  ;;  %v729_v40 = vadd.f32 1.0, %v1157_v32  ;;  %1184 = vtanh.f32 %v674_v29  ;;  %v673_v41 = vmul.f32 0.5, %v547_v30  ;;  %v1032_v42 = vpop.f32.mrf.mxu1 }
 0x103   : > { %v1161_v43 = vpop.eup %1160  ;;  %v778_v44 = vmul.f32 0.5, %v746_v33  ;;  %v745_v45 = vadd.f32 1.0, %v1159_v38  ;;  %1186 = vtanh.f32 %v690_v34  ;;  %v689_v46 = vmul.f32 0.5, %v627_v35  ;;  %v556_v47 = vpop.f32.mrf.mxu0 }
 0x104   : > { %v1163_v48 = vpop.eup %1162  ;;  %794 = vst [vmem:[%s1462_s20 + $0x8] sm:$0xff] %v762_v39  ;;  %v761_v49 = vmul.f32 0.5, %v729_v40  ;;  %v732_v50 = vadd.f32 1.0, %v1161_v43  ;;  %1188 = vtanh.f32 %v673_v41  ;;  %v562_v51 = vadd.f32 %v1008_v37, %v1434_v36  ;;  %v636_v52 = vpop.f32.mrf.mxu1 }
 0x105   : > { %v1165_v53 = vpop.eup %1164  ;;  %810 = vst [vmem:[%s1462_s20 + $0x88] sm:$0xff] %v778_v44  ;;  %v777_v54 = vmul.f32 0.5, %v745_v45  ;;  %v748_v55 = vadd.f32 1.0, %v1163_v48  ;;  %1190 = vtanh.f32 %v689_v46  ;;  %v642_v56 = vadd.f32 %v1032_v42, %v1434_v36  ;;  %v1011_v57 = vpop.f32.mrf.mxu0 }
 0x106   : > { %v1167_v58 = vpop.eup %1166  ;;  %793 = vst [vmem:[%s1462_s20] sm:$0xff] %v761_v49  ;;  %v764_v59 = vmul.f32 0.5, %v732_v50  ;;  %v731_v60 = vadd.f32 1.0, %v1165_v53  ;;  %v676_v61 = vmul.f32 0.5, %v562_v51  ;;  %v557_v62 = vadd.f32 %v1434_v36, %v556_v47  ;;  %v1035_v63 = vpop.f32.mrf.mxu1 }
 0x107   : > { %v1169_v0 = vpop.eup %1168  ;;  %809 = vst [vmem:[%s1462_s20 + $0x80] sm:$0xff] %v777_v54  ;;  %v780_v1 = vmul.f32 0.5, %v748_v55  ;;  %v747_v2 = vadd.f32 1.0, %v1167_v58  ;;  %v692_v3 = vmul.f32 0.5, %v642_v56  ;;  %v637_v4 = vadd.f32 %v1434_v36, %v636_v52  ;;  %v566_v5 = vpop.f32.mrf.mxu0 }
 0x108   : > { %v1171_v6 = vpop.eup %1170  ;;  %796 = vst [vmem:[%s1462_s20 + $0x18] sm:$0xff] %v764_v59  ;;  %v763_v7 = vmul.f32 0.5, %v731_v60  ;;  %v734_v8 = vadd.f32 1.0, %v1169_v0  ;;  %1192 = vtanh.f32 %v676_v61  ;;  %v675_v9 = vmul.f32 0.5, %v557_v62  ;;  %v646_v10 = vpop.f32.mrf.mxu1 }
 0x109   : > { %v1173_v11 = vpop.eup %1172  ;;  %812 = vst [vmem:[%s1462_s20 + $0x98] sm:$0xff] %v780_v1  ;;  %v779_v12 = vmul.f32 0.5, %v747_v2  ;;  %v750_v13 = vadd.f32 1.0, %v1171_v6  ;;  %1194 = vtanh.f32 %v692_v3  ;;  %v691_v14 = vmul.f32 0.5, %v637_v4  ;;  %v1014_v23 = vpop.f32.mrf.mxu0 }
 0x10a   : > { %v1175_v15 = vpop.eup %1174  ;;  %795 = vst [vmem:[%s1462_s20 + $0x10] sm:$0xff] %v763_v7  ;;  %v766_v16 = vmul.f32 0.5, %v734_v8  ;;  %v733_v17 = vadd.f32 1.0, %v1173_v11  ;;  %1196 = vtanh.f32 %v675_v9  ;;  %v572_v18 = vadd.f32 %v1011_v57, %v1434_v36  ;;  %v1038_v29 = vpop.f32.mrf.mxu1 }
 0x10b   : > { %v1177_v19 = vpop.eup %1176  ;;  %811 = vst [vmem:[%s1462_s20 + $0x90] sm:$0xff] %v779_v12  ;;  %v782_v20 = vmul.f32 0.5, %v750_v13  ;;  %v749_v21 = vadd.f32 1.0, %v1175_v15  ;;  %1198 = vtanh.f32 %v691_v14  ;;  %v652_v22 = vadd.f32 %v1035_v63, %v1434_v36  ;;  %v576_v44 = vpop.f32.mrf.mxu0 }
 0x10c   : > { %v1179_v24 = vpop.eup %1178  ;;  %798 = vst [vmem:[%s1462_s20 + $0x28] sm:$0xff] %v766_v16  ;;  %v765_v25 = vmul.f32 0.5, %v733_v17  ;;  %v736_v26 = vadd.f32 1.0, %v1177_v19  ;;  %v678_v27 = vmul.f32 0.5, %v572_v18  ;;  %v567_v28 = vadd.f32 %v1434_v36, %v566_v5  ;;  %v656_v49 = vpop.f32.mrf.mxu1 }
 0x10d   : > { %v1181_v30 = vpop.eup %1180  ;;  %814 = vst [vmem:[%s1462_s20 + $0xa8] sm:$0xff] %v782_v20  ;;  %v781_v31 = vmul.f32 0.5, %v749_v21  ;;  %v752_v32 = vadd.f32 1.0, %v1179_v24  ;;  %v694_v33 = vmul.f32 0.5, %v652_v22  ;;  %v647_v34 = vadd.f32 %v1434_v36, %v646_v10 }
 0x10e   : > { %v1183_v35 = vpop.eup %1182  ;;  %797 = vst [vmem:[%s1462_s20 + $0x20] sm:$0xff] %v765_v25  ;;  %v768_v37 = vmul.f32 0.5, %v736_v26  ;;  %v735_v38 = vadd.f32 1.0, %v1181_v30  ;;  %1200 = vtanh.f32 %v678_v27  ;;  %v677_v39 = vmul.f32 0.5, %v567_v28 }
 0x10f   : > { %v1185_v40 = vpop.eup %1184  ;;  %813 = vst [vmem:[%s1462_s20 + $0xa0] sm:$0xff] %v781_v31  ;;  %v784_v41 = vmul.f32 0.5, %v752_v32  ;;  %v751_v42 = vadd.f32 1.0, %v1183_v35  ;;  %1202 = vtanh.f32 %v694_v33  ;;  %v693_v43 = vmul.f32 0.5, %v647_v34 }
 0x110   : > { %v1187_v45 = vpop.eup %1186  ;;  %800 = vst [vmem:[%s1462_s20 + $0x38] sm:$0xff] %v768_v37  ;;  %v767_v46 = vmul.f32 0.5, %v735_v38  ;;  %v738_v47 = vadd.f32 1.0, %v1185_v40  ;;  %1204 = vtanh.f32 %v677_v39  ;;  %v582_v48 = vadd.f32 %v1014_v23, %v1434_v36 }
 0x111   : > { %v1189_v50 = vpop.eup %1188  ;;  %816 = vst [vmem:[%s1462_s20 + $0xb8] sm:$0xff] %v784_v41  ;;  %v783_v51 = vmul.f32 0.5, %v751_v42  ;;  %v754_v52 = vadd.f32 1.0, %v1187_v45  ;;  %1206 = vtanh.f32 %v693_v43  ;;  %v662_v53 = vadd.f32 %v1038_v29, %v1434_v36 }
 0x112   : > { %v1191_v54 = vpop.eup %1190  ;;  %799 = vst [vmem:[%s1462_s20 + $0x30] sm:$0xff] %v767_v46  ;;  %v770_v55 = vmul.f32 0.5, %v738_v47  ;;  %v737_v56 = vadd.f32 1.0, %v1189_v50  ;;  %v680_v57 = vmul.f32 0.5, %v582_v48  ;;  %v577_v58 = vadd.f32 %v1434_v36, %v576_v44 }
 0x113   : > { %815 = vst [vmem:[%s1462_s20 + $0xb0] sm:$0xff] %v783_v51  ;;  %v786_v59 = vmul.f32 0.5, %v754_v52  ;;  %v753_v60 = vadd.f32 1.0, %v1191_v54  ;;  %v696_v61 = vmul.f32 0.5, %v662_v53  ;;  %v657_v62 = vadd.f32 %v1434_v36, %v656_v49 }
 0x114   : > { %802 = vst [vmem:[%s1462_s20 + $0x48] sm:$0xff] %v770_v55  ;;  %v769_v63 = vmul.f32 0.5, %v737_v56  ;;  %1208 = vtanh.f32 %v680_v57  ;;  %v679_v0 = vmul.f32 0.5, %v577_v58 }
 0x115   : > { %v1193_v1 = vpop.eup %1192  ;;  %818 = vst [vmem:[%s1462_s20 + $0xc8] sm:$0xff] %v786_v59  ;;  %v785_v2 = vmul.f32 0.5, %v753_v60  ;;  %1210 = vtanh.f32 %v696_v61  ;;  %v695_v3 = vmul.f32 0.5, %v657_v62 }
 0x116   : > { %v1195_v4 = vpop.eup %1194  ;;  %801 = vst [vmem:[%s1462_s20 + $0x40] sm:$0xff] %v769_v63  ;;  %v740_v5 = vadd.f32 1.0, %v1193_v1  ;;  %1212 = vtanh.f32 %v679_v0 }
 0x117   : > { %v1197_v6 = vpop.eup %1196  ;;  %817 = vst [vmem:[%s1462_s20 + $0xc0] sm:$0xff] %v785_v2  ;;  %v756_v7 = vadd.f32 1.0, %v1195_v4  ;;  %1214 = vtanh.f32 %v695_v3 }
 0x118   : > { %v1199_v36 = vpop.eup %1198  ;;  %v772_v8 = vmul.f32 0.5, %v740_v5  ;;  %v739_v9 = vadd.f32 1.0, %v1197_v6 }
 0x119   : > { %v788_v10 = vmul.f32 0.5, %v756_v7  ;;  %v755_v11 = vadd.f32 1.0, %v1199_v36 }
 0x11a   : > { %804 = vst [vmem:[%s1462_s20 + $0x58] sm:$0xff] %v772_v8  ;;  %v771_v12 = vmul.f32 0.5, %v739_v9 }
 0x11b   : > { %v1201_v13 = vpop.eup %1200  ;;  %820 = vst [vmem:[%s1462_s20 + $0xd8] sm:$0xff] %v788_v10  ;;  %v787_v14 = vmul.f32 0.5, %v755_v11 }
 0x11c   : > { %v1203_v15 = vpop.eup %1202  ;;  %803 = vst [vmem:[%s1462_s20 + $0x50] sm:$0xff] %v771_v12  ;;  %v742_v16 = vadd.f32 1.0, %v1201_v13 }
 0x11d   : > { %v1205_v17 = vpop.eup %1204  ;;  %819 = vst [vmem:[%s1462_s20 + $0xd0] sm:$0xff] %v787_v14  ;;  %v758_v18 = vadd.f32 1.0, %v1203_v15 }
 0x11e   : > { %v1207_v19 = vpop.eup %1206  ;;  %v774_v20 = vmul.f32 0.5, %v742_v16  ;;  %v741_v21 = vadd.f32 1.0, %v1205_v17 }
 0x11f   : > { %v790_v22 = vmul.f32 0.5, %v758_v18  ;;  %v757_v23 = vadd.f32 1.0, %v1207_v19 }
 0x120   : > { %806 = vst [vmem:[%s1462_s20 + $0x68] sm:$0xff] %v774_v20  ;;  %v773_v24 = vmul.f32 0.5, %v741_v21 }
 0x121   : > { %v1209_v25 = vpop.eup %1208  ;;  %822 = vst [vmem:[%s1462_s20 + $0xe8] sm:$0xff] %v790_v22  ;;  %v789_v26 = vmul.f32 0.5, %v757_v23 }
 0x122   : > { %v1211_v27 = vpop.eup %1210  ;;  %805 = vst [vmem:[%s1462_s20 + $0x60] sm:$0xff] %v773_v24  ;;  %v744_v28 = vadd.f32 1.0, %v1209_v25 }
 0x123   : > { %v1213_v29 = vpop.eup %1212  ;;  %821 = vst [vmem:[%s1462_s20 + $0xe0] sm:$0xff] %v789_v26  ;;  %v760_v30 = vadd.f32 1.0, %v1211_v27 }
 0x124   : > { %v1215_v31 = vpop.eup %1214  ;;  %v776_v32 = vmul.f32 0.5, %v744_v28  ;;  %v743_v33 = vadd.f32 1.0, %v1213_v29 }
 0x125   : > { %v792_v34 = vmul.f32 0.5, %v760_v30  ;;  %v759_v35 = vadd.f32 1.0, %v1215_v31 }
 0x126   : > { %808 = vst [vmem:[%s1462_s20 + $0x78] sm:$0xff] %v776_v32  ;;  %v775_v37 = vmul.f32 0.5, %v743_v33 }
 0x127   : > { %824 = vst [vmem:[%s1462_s20 + $0xf8] sm:$0xff] %v792_v34  ;;  %v791_v38 = vmul.f32 0.5, %v759_v35 }
 0x128   : > { %807 = vst [vmem:[%s1462_s20 + $0x70] sm:$0xff] %v775_v37 }
 0x129   : > { %823 = vst [vmem:[%s1462_s20 + $0xf0] sm:$0xff] %v791_v38 }
 0x12a   : > { %1229 = shalt.err (!%p1226_p3)
}
 0x12b   : > { %s1230_s6 = scalar_lea.hbm %s1510_s28, 4096  ;;  %s1234_s9 = scalar_lea.hbm %s1562_s3, 8192 }
 0x12c   : > { %p1231_p4 = scmp.ne.s32.totalorder %s1510_s28, %s1230_s6  ;;  %p1235_p9 = scmp.lt.s32.totalorder %s1510_s28, %s1562_s3 }
 0x12d   : > { %p1236_p10 = scmp.lt.s32.totalorder %s1234_s9, %s1230_s6 }
 0x12e   : > { %p1232_p7 = pnand %p1231_p4, %p1339_p5 }
 0x12f   : > { %p1237_p11 = por %p1236_p10, %p1235_p9 }
 0x130   : > { %p1233_p8 = pneg %p1232_p7 }
 0x132   : > { %p1238_p12 = pnand %p1237_p11, %p1233_p8 }
 0x134   : > { %1241 = shalt.err (!%p1238_p12)
}
 0x135   : > { %s1279_s17 = smov 128   ;;  %s1280_s19 = smov 8  }
 0x136   : > { %1047 = dma.vmem_to_hbm [thread:$0]  (%p1339_p5), %s1512_s25, 4096, %s1510_s28, %s1519_s16, %s1279_s17, %s1279_s17, %s1280_s19  }
 0x137 PF: > { %p1053_p13 = scmp.ge.s32.totalorder %s1276_s15, 2  ;;  %s854_s20 = sand.u32 1, %s1264_s12  }
 0x138   : > { %s855_s24 = scalar_lea.sflag [#allocation3], %s854_s20 }
 0x139   : > { %p1050_p0 = pnand %p1053_p13, %p1343_p6 }
 0x13b   : > { %p1051_p1 = pneg %p1050_p0 }
 0x13d   : > { %1259 = dma.done.wait (%p1051_p1), %s855_s24, 4096  }
 0x13e   : > { %1261 = vsyncadd (%p1051_p1), %s855_s24, 4294963200  ;;  %p13_p2 = scmp.ge.s32.totalorder %s1326_s18, 4   ;;  %s1565_s12 = smov %s1268_s13 }
 0x13f   : > { %s1566_s13 = smov %s1272_s14  ;;  %s1567_s14 = smov %s1337_s21 }
 0x140   : > { %s1568_s15 = smov %s1326_s18  ;;  %15 = sbr.rel (!%p13_p2) target bundleno = 3 (0x3), region = 67 }
 0x145   :  { %860 = vsyncpa [#allocation3], 1 }
 0x146   :  { %862 = vsyncpa [#allocation3 + $0x1], 1 }

</bundles_post_ra>
